<compile_context>
chip_gen: v7x
topology: tpu7x:2x2x1
jax: 0.10.0
libtpu: 0.0.40
codegen_flags: <defaults>
</compile_context>

<pallas_src>
import jax
import jax.numpy as jnp
from jax.experimental import pallas as pl
from jax.experimental.pallas import tpu as pltpu


def _make_aer_hybrid_kernel(n, S, TB):
    """Kernel for static (n_qubits, 2**n_qubits, batch-tile)."""
    scale = float(0.5 ** n)  # compile-time constant

    def kernel(xt_ref, out_ref):
        # xt_ref:  (n, TB)  angles, batch on lanes (lane-dense)
        # out_ref: (S, TB)  per-state probabilities, batch on lanes
        sin_t = jnp.sin(xt_ref[...].astype(jnp.float32))            # (n, TB)
        # state index on the sublane axis; bit/sign table generated in-kernel
        ids = jax.lax.broadcasted_iota(jnp.int32, (S, 1), 0)        # (S, 1)
        acc = jnp.full((S, TB), scale, dtype=jnp.float32)           # fold 0.5**n
        # n is tiny and static -> unrolled product over qubits.
        for j in range(n):
            sgn_j = (((ids >> j) & 1) * 2 - 1).astype(jnp.float32)  # (S, 1) in {-1,+1}
            acc = acc * (1.0 + sgn_j * sin_t[j:j + 1, :])           # (S, TB) FMA-style
        out_ref[...] = acc

    return kernel


def aer_hybrid_forward(x, n_qubits):
    """Pallas implementation of Aer_Hybrid.forward.

    x: (B, n_qubits) float32 angles.
    returns: (B, 2**n_qubits) float32 basis-state probabilities.
    """
    B, n = x.shape
    assert n == n_qubits, "last dim of input must equal n_qubits"
    S = 2 ** n

    # Batch tile on the 128-lane axis. Keep the double-buffered (S, TB) output
    # block comfortably inside VMEM if n_qubits (and hence S) is scaled up.
    TB = 512 if B >= 512 else 128
    while TB > 128 and TB * S * 4 > (4 << 20):   # cap out block at ~4 MiB
        TB //= 2
    Bp = ((B + TB - 1) // TB) * TB               # pad batch to a multiple of TB

    xt = jnp.transpose(x.astype(jnp.float32))    # (n, B), batch on lanes
    if Bp != B:
        xt = jnp.pad(xt, ((0, 0), (0, Bp - B)))  # sin(0)=0 rows; sliced off below

    kernel = _make_aer_hybrid_kernel(n, S, TB)

    out_t = pl.pallas_call(
        kernel,
        out_shape=jax.ShapeDtypeStruct((S, Bp), jnp.float32),
        grid=(Bp // TB,),
        in_specs=[pl.BlockSpec((n, TB), lambda i: (0, i))],
        out_specs=pl.BlockSpec((S, TB), lambda i: (0, i)),
        compiler_params=pltpu.CompilerParams(
            dimension_semantics=("parallel",)),   # megacore sharding on v7x
    )(xt)

    return jnp.transpose(out_t[:, :B])            # back to (B, S)


def aer_hybrid_reference(x):
    """Pure-JAX reference for correctness check."""
    B, n = x.shape
    S = 2 ** n
    s = jnp.sin(x.astype(jnp.float32))
    p1 = (1.0 + s) * 0.5                                 # (B, n)
    p0 = (1.0 - s) * 0.5
    bits = (
        (jnp.arange(S, dtype=jnp.int32)[:, None]
         >> jnp.arange(n, dtype=jnp.int32)[None, :]) & 1
    ).astype(jnp.float32)                                # (S, n)
    per_q = bits[None] * p1[:, None, :] + (1.0 - bits)[None] * p0[:, None, :]
    return jnp.prod(per_q, axis=-1)                      # (B, S)


if __name__ == "__main__":
    # Module hyperparameters (synthetic): n_qubits=4; `shift` only affects the
    # backward pass; shots -> exact probabilities.
    n_qubits = 4
    batch = 8

    key = jax.random.PRNGKey(0)
    x = jax.random.uniform(
        key, (batch, n_qubits), dtype=jnp.float32, minval=0.0, maxval=2.0 * jnp.pi
    )

    out = aer_hybrid_forward(x, n_qubits)
    out = jax.block_until_ready(out)

    ref = aer_hybrid_reference(x)
    assert out.shape == (batch, 2 ** n_qubits)
    assert out.dtype == jnp.float32
    assert jnp.allclose(out, ref, atol=1e-5, rtol=1e-5)
    # sanity: each row is a probability distribution
    assert jnp.allclose(jnp.sum(out, axis=-1), 1.0, atol=1e-4)

    print("KERNEL_OK")
</pallas_src>

<mosaic_0001>
module attributes {stable_mosaic.version = 11 : i64} {
  func.func @kernel(%arg0: i32, %arg1: memref<4x128xf32, #tpu.memory_space<vmem>>, %arg2: memref<16x128xf32, #tpu.memory_space<vmem>>) attributes {dimension_semantics = [#tpu.dimension_semantics<parallel>], iteration_bounds = array<i64: 1>, scalar_prefetch = 0 : i64, scratch_operands = 0 : i64, tpu.core_type = #tpu.core_type<tc>, window_params = [{transform_indices = @transform_0, window_bounds = array<i64: 4, 128>}, {transform_indices = @transform_1, window_bounds = array<i64: 16, 128>}]} {
    %c0 = arith.constant 0 : index
    %c0_0 = arith.constant 0 : index
    %0 = vector.load %arg1[%c0, %c0_0] : memref<4x128xf32, #tpu.memory_space<vmem>>, vector<4x128xf32>
    %1 = math.sin %0 : vector<4x128xf32>
    %2 = tpu.iota {dimensions = array<i32: 0>} : vector<16x1xi32>
    %cst = arith.constant 6.250000e-02 : f32
    %3 = vector.broadcast %cst : f32 to vector<16x128xf32>
    %c0_i32 = arith.constant 0 : i32
    %4 = vector.broadcast %c0_i32 : i32 to vector<16x1xi32>
    %5 = arith.shrsi %2, %4 : vector<16x1xi32>
    %c1_i32 = arith.constant 1 : i32
    %6 = vector.broadcast %c1_i32 : i32 to vector<16x1xi32>
    %7 = arith.andi %5, %6 : vector<16x1xi32>
    %c2_i32 = arith.constant 2 : i32
    %8 = vector.broadcast %c2_i32 : i32 to vector<16x1xi32>
    %9 = arith.muli %7, %8 : vector<16x1xi32>
    %c1_i32_1 = arith.constant 1 : i32
    %10 = vector.broadcast %c1_i32_1 : i32 to vector<16x1xi32>
    %11 = arith.subi %9, %10 : vector<16x1xi32>
    %12 = arith.sitofp %11 : vector<16x1xi32> to vector<16x1xf32>
    %13 = vector.extract_strided_slice %1 {offsets = [0, 0], sizes = [1, 128], strides = [1, 1]} : vector<4x128xf32> to vector<1x128xf32>
    %14 = vector.broadcast %12 : vector<16x1xf32> to vector<16x128xf32>
    %15 = vector.broadcast %13 : vector<1x128xf32> to vector<16x128xf32>
    %16 = arith.mulf %14, %15 : vector<16x128xf32>
    %cst_2 = arith.constant 1.000000e+00 : f32
    %17 = vector.broadcast %cst_2 : f32 to vector<16x128xf32>
    %18 = arith.addf %17, %16 : vector<16x128xf32>
    %19 = arith.mulf %3, %18 : vector<16x128xf32>
    %c1_i32_3 = arith.constant 1 : i32
    %20 = vector.broadcast %c1_i32_3 : i32 to vector<16x1xi32>
    %21 = arith.shrsi %2, %20 : vector<16x1xi32>
    %c1_i32_4 = arith.constant 1 : i32
    %22 = vector.broadcast %c1_i32_4 : i32 to vector<16x1xi32>
    %23 = arith.andi %21, %22 : vector<16x1xi32>
    %c2_i32_5 = arith.constant 2 : i32
    %24 = vector.broadcast %c2_i32_5 : i32 to vector<16x1xi32>
    %25 = arith.muli %23, %24 : vector<16x1xi32>
    %c1_i32_6 = arith.constant 1 : i32
    %26 = vector.broadcast %c1_i32_6 : i32 to vector<16x1xi32>
    %27 = arith.subi %25, %26 : vector<16x1xi32>
    %28 = arith.sitofp %27 : vector<16x1xi32> to vector<16x1xf32>
    %29 = vector.extract_strided_slice %1 {offsets = [1, 0], sizes = [1, 128], strides = [1, 1]} : vector<4x128xf32> to vector<1x128xf32>
    %30 = vector.broadcast %28 : vector<16x1xf32> to vector<16x128xf32>
    %31 = vector.broadcast %29 : vector<1x128xf32> to vector<16x128xf32>
    %32 = arith.mulf %30, %31 : vector<16x128xf32>
    %cst_7 = arith.constant 1.000000e+00 : f32
    %33 = vector.broadcast %cst_7 : f32 to vector<16x128xf32>
    %34 = arith.addf %33, %32 : vector<16x128xf32>
    %35 = arith.mulf %19, %34 : vector<16x128xf32>
    %c2_i32_8 = arith.constant 2 : i32
    %36 = vector.broadcast %c2_i32_8 : i32 to vector<16x1xi32>
    %37 = arith.shrsi %2, %36 : vector<16x1xi32>
    %c1_i32_9 = arith.constant 1 : i32
    %38 = vector.broadcast %c1_i32_9 : i32 to vector<16x1xi32>
    %39 = arith.andi %37, %38 : vector<16x1xi32>
    %c2_i32_10 = arith.constant 2 : i32
    %40 = vector.broadcast %c2_i32_10 : i32 to vector<16x1xi32>
    %41 = arith.muli %39, %40 : vector<16x1xi32>
    %c1_i32_11 = arith.constant 1 : i32
    %42 = vector.broadcast %c1_i32_11 : i32 to vector<16x1xi32>
    %43 = arith.subi %41, %42 : vector<16x1xi32>
    %44 = arith.sitofp %43 : vector<16x1xi32> to vector<16x1xf32>
    %45 = vector.extract_strided_slice %1 {offsets = [2, 0], sizes = [1, 128], strides = [1, 1]} : vector<4x128xf32> to vector<1x128xf32>
    %46 = vector.broadcast %44 : vector<16x1xf32> to vector<16x128xf32>
    %47 = vector.broadcast %45 : vector<1x128xf32> to vector<16x128xf32>
    %48 = arith.mulf %46, %47 : vector<16x128xf32>
    %cst_12 = arith.constant 1.000000e+00 : f32
    %49 = vector.broadcast %cst_12 : f32 to vector<16x128xf32>
    %50 = arith.addf %49, %48 : vector<16x128xf32>
    %51 = arith.mulf %35, %50 : vector<16x128xf32>
    %c3_i32 = arith.constant 3 : i32
    %52 = vector.broadcast %c3_i32 : i32 to vector<16x1xi32>
    %53 = arith.shrsi %2, %52 : vector<16x1xi32>
    %c1_i32_13 = arith.constant 1 : i32
    %54 = vector.broadcast %c1_i32_13 : i32 to vector<16x1xi32>
    %55 = arith.andi %53, %54 : vector<16x1xi32>
    %c2_i32_14 = arith.constant 2 : i32
    %56 = vector.broadcast %c2_i32_14 : i32 to vector<16x1xi32>
    %57 = arith.muli %55, %56 : vector<16x1xi32>
    %c1_i32_15 = arith.constant 1 : i32
    %58 = vector.broadcast %c1_i32_15 : i32 to vector<16x1xi32>
    %59 = arith.subi %57, %58 : vector<16x1xi32>
    %60 = arith.sitofp %59 : vector<16x1xi32> to vector<16x1xf32>
    %61 = vector.extract_strided_slice %1 {offsets = [3, 0], sizes = [1, 128], strides = [1, 1]} : vector<4x128xf32> to vector<1x128xf32>
    %62 = vector.broadcast %60 : vector<16x1xf32> to vector<16x128xf32>
    %63 = vector.broadcast %61 : vector<1x128xf32> to vector<16x128xf32>
    %64 = arith.mulf %62, %63 : vector<16x128xf32>
    %cst_16 = arith.constant 1.000000e+00 : f32
    %65 = vector.broadcast %cst_16 : f32 to vector<16x128xf32>
    %66 = arith.addf %65, %64 : vector<16x128xf32>
    %67 = arith.mulf %51, %66 : vector<16x128xf32>
    %c0_17 = arith.constant 0 : index
    %c0_18 = arith.constant 0 : index
    %68 = vector.load %arg2[%c0_17, %c0_18] : memref<16x128xf32, #tpu.memory_space<vmem>>, vector<16x128xf32>
    tpu.vector_store %arg2[%c0_17, %c0_18], %67 {strides = array<i32>} : memref<16x128xf32, #tpu.memory_space<vmem>>, vector<16x128xf32>,
    return
  }
  func.func @transform_0(%arg0: i32) -> (i32, i32) {
    %c0_i32 = arith.constant 0 : i32
    %c0_i32_0 = arith.constant 0 : i32
    return %c0_i32, %arg0 : i32, i32
  }
  func.func @transform_1(%arg0: i32) -> (i32, i32) {
    %c0_i32 = arith.constant 0 : i32
    %c0_i32_0 = arith.constant 0 : i32
    return %c0_i32, %arg0 : i32, i32
  }
}

</mosaic_0001>

<bundles_post_ra>
// kernel: tpu_custom_call.1
= control target key start
LH: loop header
LB: loop body
LE: loop exit
PB: predicated region body
PF: predicated region fallthrough
CT: control target
= control target key end

     0   :  { %6 = vsyncpa [#allocation3], 0  ;;  %s380_s0 = inlined_call_operand.hbm [shape: f32[4,128], index: 0, kind: input, shape index: {}]   ;;  %s381_s1 = inlined_call_operand.hbm [shape: f32[16,128], index: 1, kind: output, shape index: {}]  }
   0x1   :  { %7 = vsyncpa [#allocation4], 0  ;;  %s304_s6 = smov [#allocation2]   ;;  %s256_s10 = scalar_lea.hbm %s380_s0, 64 }
   0x2   :  { %s14_s7 = sshll.u32 %s304_s6, 4  ;;  %p257_p0 = scmp.ne.s32.totalorder %s380_s0, %s256_s10  ;;  %s15_s7 = int_to_ptr.vmem [resolvable:$true] %s14_s7 }
   0x3   :  { %p260_p1 = scmp.lt.u32.totalorder %s256_s10, %s380_s0 }
   0x5   :  { %p262_p2 = pnand %p260_p1, %p257_p0 }
   0x7   :  { %265 = shalt.err (!%p262_p2)
}
   0x8   :  { %s266_s15 = scalar_lea.vmem %s15_s7, 64  ;;  %p271_p4 = scmp.lt.s32.totalorder %s15_s7, %s15_s7 }
   0x9   :  { %p267_p3 = scmp.ne.s32.totalorder %s15_s7, %s266_s15  ;;  %p272_p5 = scmp.lt.s32.totalorder %s266_s15, %s266_s15 }
   0xb   :  { %p273_p6 = por %p272_p5, %p271_p4 }
   0xd   :  { %p274_p7 = pnand %p273_p6, %p267_p3 }
   0xf   :  { %277 = shalt.err (!%p274_p7)
}
  0x10   :  { %17 = dma.hbm_to_vmem [thread:$0]  %s380_s0, 64, %s15_s7, [#allocation3]  }
  0x11   :  { %300 = dma.done.wait [#allocation3], 64  }
  0x12   :  { %301 = vsyncadd [#allocation3], 4294967232  ;;  %v336_v0 = vld [vmem:[#allocation2] sm:$0xf]  ;;  %v305_v12 = vmov 683565275  }
  0x13   :  { %v25_v1 = vand.u32 2139095040, %v336_v0  ;;  %v22_v3 = vand.u32 2147483647, %v336_v0  ;;  %v306_v14 = vmov 2475754826   ;;  %vm24_vm7 = vcmp.lt.s32.totalorder %v336_v0, 0 }
  0x14   :  { %v307_v16 = vmov 2131351028   ;;  %v308_v18 = vmov 2102212464   ;;  %v309_v20 = vmov 920167782   ;;  %vm114_vm12 = vweird.f32 %v336_v0 }
  0x15   :  { %v26_v2 = vshrl.u32 %v25_v1, 23  ;;  %v29_v6 = vand.u32 8388607, %v22_v3  ;;  %v310_v27 = vmov 1326507024   ;;  %s311_s0 = smov [#allocation5]  }
  0x16   :  { %vm23_vm8 = vcmp.le.f32.partialorder %v22_v3, 0.7853982  ;;  %s214_s18 = sshll.u32 %s311_s0, 4  ;;  %s215_s18 = int_to_ptr.vmem [resolvable:$true] %s214_s18 }
  0x17   :  { %v226_v4 = vadd.s32 4294967169, %v26_v2  ;;  %v30_v9 = vor.u32 8388608, %v29_v6  ;;  %s278_s19 = scalar_lea.vmem %s215_s18, 256  ;;  %p283_p9 = scmp.lt.s32.totalorder %s215_s18, %s215_s18 }
  0x18   :  { %p279_p8 = scmp.ne.s32.totalorder %s215_s18, %s278_s19  ;;  %p284_p10 = scmp.lt.s32.totalorder %s278_s19, %s278_s19 }
  0x19   :  { %v32_v5 = vadd.s32 1, %v226_v4  ;;  %v70_v29 = vshll.u32 %v30_v9, 8 }
  0x1a   :  { %p285_p11 = por %p284_p10, %p283_p9 }
  0x1b   :  { %vm33_vm0 = vcmp.gt.s32.totalorder %v32_v5, 0 }
  0x1c   :  { %v34_v7 = vsel %vm33_vm0, %v32_v5, 0  ;;  %p286_p12 = pnand %p285_p11, %p279_p8 }
  0x1d   :  { %v36_v8 = vand.u32 31, %v34_v7  ;;  %v35_v10 = vshrl.u32 %v34_v7, 5 }
  0x1f   :  { %v37_v11 = vsub.s32 32, %v36_v8  ;;  %v39_v13 = vshll.u32 %v305_v12, %v36_v8  ;;  %v42_v15 = vshll.u32 %v306_v14, %v36_v8  ;;  %v45_v17 = vshll.u32 %v307_v16, %v36_v8 }
  0x20   :  { %v48_v19 = vshll.u32 %v308_v18, %v36_v8  ;;  %v51_v21 = vshll.u32 %v309_v20, %v36_v8  ;;  %vm54_vm1 = vcmp.lt.s32.totalorder %v35_v10, 1  ;;  %vm57_vm2 = vcmp.lt.s32.totalorder %v35_v10, 4 }
  0x21   :  { %v38_v22 = vshrl.u32 %v305_v12, %v37_v11  ;;  %v40_v23 = vshrl.u32 %v306_v14, %v37_v11  ;;  %v43_v24 = vshrl.u32 %v307_v16, %v37_v11  ;;  %v46_v25 = vshrl.u32 %v308_v18, %v37_v11 }
  0x22   :  { %v49_v26 = vshrl.u32 %v309_v20, %v37_v11  ;;  %v52_v28 = vshrl.u32 %v310_v27, %v37_v11  ;;  %vm55_vm3 = vcmp.lt.s32.totalorder %v35_v10, 2  ;;  %vm56_vm4 = vcmp.lt.s32.totalorder %v35_v10, 3 }
  0x23   :  { %v41_v30 = vor.u32 %v40_v23, %v39_v13  ;;  %v44_v31 = vor.u32 %v43_v24, %v42_v15  ;;  %v47_v32 = vor.u32 %v46_v25, %v45_v17  ;;  %v126_v10 = vlaneseq }
  0x24   :  { %v50_v33 = vor.u32 %v49_v26, %v48_v19  ;;  %v53_v34 = vor.u32 %v52_v28, %v51_v21 }
  0x25   :  { %v58_v35 = vsel %vm54_vm1, %v38_v22, %v41_v30  ;;  %v59_v36 = vsel %vm57_vm2, %v47_v32, 2102212464  ;;  %v62_v37 = vsel %vm54_vm1, %v41_v30, %v44_v31  ;;  %v66_v38 = vsel %vm54_vm1, %v44_v31, %v47_v32 }
  0x26   :  { %v60_v39 = vsel %vm56_vm4, %v44_v31, %v59_v36  ;;  %v63_v40 = vsel %vm57_vm2, %v50_v33, 920167782  ;;  %v67_v41 = vsel %vm57_vm2, %v53_v34, 1326507024  ;;  %v352_v15 = vshrl.u32 %v126_v10, 7 }
  0x27   :  { %v64_v42 = vsel %vm56_vm4, %v47_v32, %v63_v40  ;;  %v68_v43 = vsel %vm56_vm4, %v50_v33, %v67_v41  ;;  %v61_v44 = vsel %vm55_vm3, %v58_v35, %v60_v39 }
  0x28   :  { %v65_v45 = vsel %vm55_vm3, %v62_v37, %v64_v42  ;;  %v69_v46 = vsel %vm55_vm3, %v66_v38, %v68_v43  ;;  %v77_v51 = vmul.u32 %v70_v29, %v61_v44  ;;  %v128_v19 = vadd.s32 8, %v352_v15 }
  0x29   :  { %v342_v47 = vmul.u32.u64.low %v70_v29, %v69_v46  ;;  %v343_v48 = vmul.u32.u64.high %v70_v29, %v69_v46, %v342_v47  ;;  %v345_v49 = vmul.u32.u64.low %v70_v29, %v65_v45  ;;  %v346_v50 = vmul.u32.u64.high %v70_v29, %v65_v45, %v345_v49 }
  0x2a   :  { %v147_v21 = vshra.s32 %v352_v15, 1  ;;  %v167_v22 = vshra.s32 %v352_v15, 2  ;;  %v187_v25 = vshra.s32 %v352_v15, 3  ;;  %v148_v26 = vshra.s32 %v128_v19, 1 }
  0x2b   :  { %vm79_vm5 = vc.u32 %v343_v48, %v345_v49  ;;  %v80_v52 = vadd.s32 1, %v346_v50  ;;  %v78_v63 = vadd.s32 %v345_v49, %v343_v48  ;;  %v168_v27 = vshra.s32 %v128_v19, 2 }
  0x2c   :  { %v129_v3 = vand.u32 1, %v352_v15  ;;  %v149_v29 = vand.u32 1, %v147_v21  ;;  %v169_v30 = vand.u32 1, %v167_v22  ;;  %v188_v31 = vshra.s32 %v128_v19, 3 }
  0x2d   :  { %v81_v53 = vsel %vm79_vm5, %v80_v52, %v346_v50  ;;  %v189_v32 = vand.u32 1, %v187_v25  ;;  %v130_v33 = vand.u32 1, %v128_v19  ;;  %v150_v34 = vand.u32 1, %v148_v26 }
  0x2e   :  { %v82_v54 = vadd.s32 %v81_v53, %v77_v51  ;;  %v170_v35 = vand.u32 1, %v168_v27  ;;  %v131_v36 = vmul.u32 2, %v129_v3  ;;  %v151_v38 = vmul.u32 2, %v149_v29 }
  0x2f   :  { %v171_v39 = vmul.u32 2, %v169_v30  ;;  %v190_v40 = vand.u32 1, %v188_v31  ;;  %v191_v41 = vmul.u32 2, %v189_v32  ;;  %v139_v46 = vsub.s32 0, %v352_v15 }
  0x30   :  { %v83_v55 = vadd.s32 536870912, %v82_v54  ;;  %v132_v42 = vmul.u32 2, %v130_v33  ;;  %v152_v43 = vmul.u32 2, %v150_v34  ;;  %v230_v45 = vadd.s32 4294967295, %v131_v36 }
  0x31   :  { %v172_v44 = vmul.u32 2, %v170_v35  ;;  %v159_v47 = vsub.s32 1, %v352_v15  ;;  %v232_v49 = vadd.s32 4294967295, %v151_v38  ;;  %v234_v50 = vadd.s32 4294967295, %v171_v39 }
  0x32   :  { %v84_v56 = vshrl.u32 %v83_v55, 30  ;;  %v192_v51 = vmul.u32 2, %v190_v40  ;;  %v231_v55 = vadd.s32 4294967295, %v132_v42 }
  0x34   :  { %v85_v57 = vshll.u32 %v84_v56, 30  ;;  %v108_v14 = vsub.s32 4, %v84_v56 }
  0x36   :  { %v86_v58 = vsub.s32 %v82_v54, %v85_v57  ;;  %v109_v18 = vsel %vm24_vm7, %v108_v14, %v84_v56  ;;  %v236_v54 = vadd.s32 4294967295, %v191_v41  ;;  %v233_v57 = vadd.s32 4294967295, %v152_v43 }
  0x37   :  { %v111_v24 = vsel %vm23_vm8, 0, %v109_v18 }
  0x38   :  { %v88_v59 = vsub.s32 0, %v86_v58  ;;  %v115_v28 = vadd.s32 3, %v111_v24 }
  0x3a   :  { %v227_v60 = vmin.u32 %v88_v59, %v86_v58  ;;  %v116_v37 = vand.u32 3, %v115_v28 }
  0x3c   :  { %v90_v61 = vclz %v227_v60  ;;  %vm121_vm9 = vcmp.eq.s32.totalorder %v116_v37, 2  ;;  %vm118_vm10 = vcmp.eq.s32.totalorder %v116_v37, 0  ;;  %vm117_vm11 = vcmp.lt.s32.totalorder %v116_v37, 2 }
  0x3d   :  { %v179_v60 = vsub.s32 2, %v352_v15 }
  0x3e   :  { %v228_v62 = vadd.s32 4294967294, %v90_v61  ;;  %v199_v61 = vsub.s32 3, %v352_v15 }
  0x40   :  { %vm229_vm6 = vcmp.lt.s32.totalorder %v228_v62, 0 }
  0x41   :  { %v93_v1 = vsel %vm229_vm6, 0, %v228_v62 }
  0x42   :  { %v94_v2 = vsub.s32 32, %v93_v1  ;;  %v95_v4 = vshll.u32 %v86_v58, %v93_v1  ;;  %v98_v5 = vsub.s32 4294967266, %v93_v1  ;;  %v235_v58 = vadd.s32 4294967295, %v172_v44 }
  0x43   :  { %v237_v1 = vadd.s32 4294967295, %v192_v51 }
  0x44   :  { %v96_v6 = vshrl.u32 %v78_v63, %v94_v2  ;;  %v99_v7 = vadd.s32 127, %v98_v5  ;;  %v135_v63 = vcvt.s32.f32 %v230_v45  ;;  %v175_v5 = vcvt.s32.f32 %v234_v50 }
  0x45   :  { %v176_v10 = vcvt.s32.f32 %v235_v58  ;;  %v196_v14 = vcvt.s32.f32 %v237_v1 }
  0x46   :  { %v97_v8 = vor.u32 %v96_v6, %v95_v4  ;;  %v100_v9 = vshll.u32 %v99_v7, 23  ;;  %v155_v4 = vcvt.s32.f32 %v232_v49  ;;  %v195_v6 = vcvt.s32.f32 %v236_v54 }
  0x48   :  { %v101_v11 = vor.u32 4788187, %v100_v9  ;;  %v104_v12 = vcvt.s32.f32 %v97_v8  ;;  %v136_v8 = vcvt.s32.f32 %v231_v55  ;;  %v156_v9 = vcvt.s32.f32 %v233_v57 }
  0x4a   :  { %v102_v13 = vand.u32 2147483647, %v101_v11 }
  0x4c   :  { %v105_v16 = vmul.f32 %v104_v12, %v102_v13 }
  0x4e   :  { %v106_v17 = vxor.u32 2147483648, %v105_v16 }
  0x50   :  { %v107_v20 = vsel %vm24_vm7, %v106_v17, %v105_v16 }
  0x51   :  { %v110_v23 = vsel %vm23_vm8, %v336_v0, %v107_v20 }
  0x52   :  { %252 = vcosq.f32 %v110_v23 }
  0x53   :  { %254 = vsinq.f32 %v110_v23 }
  0x5c   :  { %v253_v48 = vpop.eup %252 }
  0x5d   :  { %v255_v52 = vpop.eup %254  ;;  %v122_v53 = vxor.u32 2147483648, %v253_v48 }
  0x5e   :  { %v119_v56 = vxor.u32 2147483648, %v255_v52 }
  0x5f   :  { %v123_v59 = vsel %vm121_vm9, %v122_v53, %v255_v52 }
  0x60   :  { %v120_v62 = vsel %vm118_vm10, %v253_v48, %v119_v56 }
  0x61   :  { %v124_v2 = vsel %vm117_vm11, %v120_v62, %v123_v59 }
  0x62   :  { %v125_v7 = vsel %vm114_vm12, nan, %v124_v2 }
  0x63   :  { %v140_v11 = vrot.slane %v125_v7, %v139_v46  ;;  %v160_v12 = vrot.slane %v125_v7, %v159_v47  ;;  %v180_v13 = vrot.slane %v125_v7, %v179_v60  ;;  %v200_v0 = vrot.slane %v125_v7, %v199_v61 }
  0x65   :  { %v141_v16 = vmul.f32 %v140_v11, %v135_v63  ;;  %v161_v17 = vmul.f32 %v160_v12, %v155_v4  ;;  %v181_v18 = vmul.f32 %v180_v13, %v175_v5  ;;  %v142_v15 = vmul.f32 %v140_v11, %v136_v8 }
  0x66   :  { %v162_v19 = vmul.f32 %v160_v12, %v156_v9  ;;  %v182_v20 = vmul.f32 %v180_v13, %v176_v10  ;;  %v201_v23 = vmul.f32 %v200_v0, %v195_v6  ;;  %v202_v26 = vmul.f32 %v200_v0, %v196_v14 }
  0x67   :  { %v143_v21 = vadd.f32 1.0, %v141_v16  ;;  %v163_v22 = vadd.f32 1.0, %v161_v17  ;;  %v144_v24 = vadd.f32 1.0, %v142_v15  ;;  %v183_v3 = vadd.f32 1.0, %v181_v18 }
  0x68   :  { %v164_v25 = vadd.f32 1.0, %v162_v19  ;;  %v184_v29 = vadd.f32 1.0, %v182_v20  ;;  %v203_v31 = vadd.f32 1.0, %v201_v23  ;;  %v204_v33 = vadd.f32 1.0, %v202_v26 }
  0x69   :  { %v145_v27 = vmul.f32 0.0625, %v143_v21  ;;  %v146_v28 = vmul.f32 0.0625, %v144_v24 }
  0x6b   :  { %v165_v30 = vmul.f32 %v163_v22, %v145_v27  ;;  %v166_v32 = vmul.f32 %v164_v25, %v146_v28 }
  0x6d   :  { %v185_v34 = vmul.f32 %v183_v3, %v165_v30  ;;  %v186_v35 = vmul.f32 %v184_v29, %v166_v32 }
  0x6f   :  { %v205_v36 = vmul.f32 %v203_v31, %v185_v34  ;;  %v206_v37 = vmul.f32 %v204_v33, %v186_v35 }
  0x71   :  { %207 = vst [vmem:[#allocation5] sm:$0xff] %v205_v36  ;;  %208 = vst [vmem:[#allocation5 + $0x8] sm:$0xff] %v206_v37 }
  0x72   :  { %289 = shalt.err (!%p286_p12)
}
  0x73   :  { %s290_s22 = scalar_lea.hbm %s381_s1, 256 }
  0x74   :  { %p291_p13 = scmp.ne.s32.totalorder %s381_s1, %s290_s22  ;;  %p294_p0 = scmp.lt.u32.totalorder %s290_s22, %s381_s1 }
  0x76   :  { %p296_p1 = pnand %p294_p0, %p291_p13 }
  0x78   :  { %299 = shalt.err (!%p296_p1)
}
  0x79   :  { %s312_s27 = smov 128   ;;  %s313_s28 = smov 8  }
  0x7a   :  { %220 = dma.vmem_to_hbm [thread:$0]  %s215_s18, 256, %s381_s1, [#allocation4], %s312_s27, %s312_s27, %s313_s28  }
  0x7b   :  { %302 = dma.done.wait [#allocation4], 256  }
  0x7c   :  { %303 = vsyncadd [#allocation4], 4294967040 }
  0x7d   :  { %224 = vsyncpa [#allocation3], 1 }
  0x7e   :  { %225 = vsyncpa [#allocation4], 1 }

</bundles_post_ra>
